<compile_context>
chip_gen: v7x
topology: tpu7x:2x2x1
jax: 0.10.0
libtpu: 0.0.40
codegen_flags: <defaults>
</compile_context>

<pallas_src>
import functools

import jax
import jax.numpy as jnp
from jax.experimental import pallas as pl
from jax.experimental.pallas import tpu as pltpu


# ---------------------------------------------------------------------------
# helpers
# ---------------------------------------------------------------------------

def round_up(x, m):
    return ((x + m - 1) // m) * m


def cdiv(a, b):
    return -(-a // b)


def pad_to(x, shape):
    pads = [(0, s - d) for d, s in zip(x.shape, shape)]
    return jnp.pad(x, pads)


def _pick_tile_b(batch):
    """Batch tile: multiple of 16 (bf16 packing), <=512 rows, and >=2 grid
    steps once the batch is big enough to split across v7x's two cores."""
    b16 = round_up(max(batch, 1), 16)
    if batch < 64:
        return b16                      # tiny batches: one step, minimal padding
    n_steps = max(2, cdiv(b16, 512))    # >=2 steps for megacore, cap tile at 512
    return round_up(cdiv(b16, n_steps), 16)


def _vmem_limit_bytes(resident_bytes):
    """Per-generation VMEM limit: physical capacity minus headroom."""
    try:
        phys = int(pltpu.get_tpu_info().vmem_capacity_bytes)
    except Exception:
        phys = 64 * 1024 * 1024         # conservative fallback (v7x per-TC)
    limit = max(phys - 12 * 1024 * 1024, resident_bytes + 8 * 1024 * 1024)
    return min(limit, phys - 4 * 1024 * 1024)


# ---------------------------------------------------------------------------
# kernel
# ---------------------------------------------------------------------------

def mm_mlp_kernel(text_ref, audio_ref,
                  wt1_ref, wt2_ref, wa1_ref, wa2_ref,
                  wf1_ref, wf2_ref, bias_ref, out_ref, *, fuse_cat):
    H = wt1_ref.shape[1]      # padded hidden dim
    O = wf2_ref.shape[1]      # padded output dim

    b = bias_ref[...]         # (8, PW) f32, rows 0..5 used
    bt1 = b[0:1, :H]
    bt2 = b[1:2, :H]
    ba1 = b[2:3, :H]
    ba2 = b[3:4, :H]
    bf1 = b[4:5, :H]
    bf2 = b[5:6, :O]

    relu = lambda x: jnp.maximum(x, 0.0)
    bf16 = lambda x: x.astype(jnp.bfloat16)

    # text branch: Linear -> ReLU -> Linear -> ReLU.  Keep only the bf16 copy
    # of h_t alive across the audio branch (halves intermediate footprint).
    h_t = relu(jnp.dot(text_ref[...], wt1_ref[...],
                       preferred_element_type=jnp.float32) + bt1)
    h_t = bf16(relu(jnp.dot(bf16(h_t), wt2_ref[...],
                            preferred_element_type=jnp.float32) + bt2))

    # audio branch: Linear -> ReLU -> Linear -> ReLU
    h_a = relu(jnp.dot(audio_ref[...], wa1_ref[...],
                       preferred_element_type=jnp.float32) + ba1)
    h_a = bf16(relu(jnp.dot(bf16(h_a), wa2_ref[...],
                            preferred_element_type=jnp.float32) + ba2))

    # fusion layer 1: cat([h_t, h_a], 1) @ W5 + b5
    if fuse_cat:
        # single K = 2*H dot (fills a 256-deep MXU when H == 128)
        h_cat = jnp.concatenate([h_t, h_a], axis=1)            # (tile_b, 2H) bf16
        f = relu(jnp.dot(h_cat, wf1_ref[...],
                         preferred_element_type=jnp.float32) + bf1)
    else:
        # split form: h_t @ W5_text + h_a @ W5_audio (no lane-concat copy)
        f = relu(jnp.dot(h_t, wf1_ref[:H, :],
                         preferred_element_type=jnp.float32)
                 + jnp.dot(h_a, wf1_ref[H:, :],
                           preferred_element_type=jnp.float32)
                 + bf1)

    # fusion layer 2 (no activation)
    out_ref[...] = (jnp.dot(bf16(f), wf2_ref[...],
                            preferred_element_type=jnp.float32)
                    + bf2).astype(out_ref.dtype)


# ---------------------------------------------------------------------------
# wrapper
# ---------------------------------------------------------------------------

def multimodal_mlp_forward(text_input, audio_input, weights, biases, dims,
                           tile_b=None, out_dtype=jnp.float32):
    """Returns the PADDED (batch_pad, O_pad) output block; caller slices.

    weights: dict of bf16 (in_pad, out_pad) matrices (wf1 is the stacked
    (2*H_pad, H_pad) fusion weight); biases: packed (8, PW) f32.
    """
    batch = text_input.shape[0]
    T_pad, A_pad, H_pad, O_pad = dims

    if tile_b is None:
        tile_b = _pick_tile_b(batch)
    batch_pad = round_up(batch, tile_b)
    grid = (batch_pad // tile_b,)

    # Pad + cast activations.  This fused pad/cast is hoistable: if the caller
    # already stores activations bf16-padded, it is skipped entirely.
    def prep(x, d_pad):
        if x.dtype == jnp.bfloat16 and x.shape == (batch_pad, d_pad):
            return x
        return pad_to(x, (batch_pad, d_pad)).astype(jnp.bfloat16)

    t = prep(text_input, T_pad)
    a = prep(audio_input, A_pad)

    row = lambda i: (i, 0)        # batch-tiled blocks
    const = lambda i: (0, 0)      # VMEM-resident blocks

    def resident_spec(shape):     # fetched once, single-buffered
        return pl.BlockSpec(shape, const, pipeline_mode=pl.Buffered(1))

    in_specs = [
        pl.BlockSpec((tile_b, T_pad), row),
        pl.BlockSpec((tile_b, A_pad), row),
        resident_spec((T_pad, H_pad)),
        resident_spec((H_pad, H_pad)),
        resident_spec((A_pad, H_pad)),
        resident_spec((H_pad, H_pad)),
        resident_spec((2 * H_pad, H_pad)),
        resident_spec((H_pad, O_pad)),
        resident_spec(biases.shape),
    ]

    out_size = jnp.dtype(out_dtype).itemsize
    weight_elems = (T_pad * H_pad + A_pad * H_pad + 4 * H_pad * H_pad
                    + H_pad * O_pad)
    weight_bytes = 2 * weight_elems + biases.size * 4
    act_bytes = batch_pad * (T_pad + A_pad) * 2 + batch_pad * O_pad * out_size
    flops = 2 * batch_pad * weight_elems

    # resident (single-buffered) weights + double-buffered activation/out tiles
    resident_bytes = (weight_bytes
                      + 2 * tile_b * (T_pad + A_pad) * 2
                      + 2 * tile_b * O_pad * out_size)

    out_padded = pl.pallas_call(
        functools.partial(mm_mlp_kernel, fuse_cat=(H_pad == 128)),
        out_shape=jax.ShapeDtypeStruct((batch_pad, O_pad), out_dtype),
        grid=grid,
        in_specs=in_specs,
        out_specs=pl.BlockSpec((tile_b, O_pad), row),
        compiler_params=pltpu.CompilerParams(
            dimension_semantics=("parallel",),
            vmem_limit_bytes=_vmem_limit_bytes(resident_bytes),
        ),
        cost_estimate=pl.CostEstimate(
            flops=flops, transcendentals=0,
            bytes_accessed=act_bytes + weight_bytes),
    )(t, a,
      weights["wt1"], weights["wt2"], weights["wa1"], weights["wa2"],
      weights["wf1"], weights["wf2"], biases)

    return out_padded


# ---------------------------------------------------------------------------
# parameter construction (torch-Linear-like init, (in, out) layout)
# ---------------------------------------------------------------------------

def init_params(key, text_dim, audio_dim, hidden_dim, output_dim):
    ks = jax.random.split(key, 12)

    def linear(kw, kb, fan_in, fan_out):
        bound = 1.0 / jnp.sqrt(fan_in)
        w = jax.random.uniform(kw, (fan_in, fan_out), jnp.float32, -bound, bound)
        b = jax.random.uniform(kb, (1, fan_out), jnp.float32, -bound, bound)
        return w, b

    wt1, bt1 = linear(ks[0], ks[1], text_dim, hidden_dim)
    wt2, bt2 = linear(ks[2], ks[3], hidden_dim, hidden_dim)
    wa1, ba1 = linear(ks[4], ks[5], audio_dim, hidden_dim)
    wa2, ba2 = linear(ks[6], ks[7], hidden_dim, hidden_dim)
    wf1, bf1 = linear(ks[8], ks[9], 2 * hidden_dim, hidden_dim)
    wf2, bf2 = linear(ks[10], ks[11], hidden_dim, output_dim)

    return {
        "wt1": wt1, "bt1": bt1, "wt2": wt2, "bt2": bt2,
        "wa1": wa1, "ba1": ba1, "wa2": wa2, "ba2": ba2,
        "wf1": wf1, "bf1": bf1, "wf2": wf2, "bf2": bf2,
    }


def prepare_kernel_params(p, text_dim, audio_dim, hidden_dim, output_dim):
    """Zero-pad dims to multiples of 128, cast weights to bf16, pack biases."""
    T_pad = round_up(text_dim, 128)
    A_pad = round_up(audio_dim, 128)
    H_pad = round_up(hidden_dim, 128)
    O_pad = round_up(output_dim, 128)
    PW = max(H_pad, O_pad)

    wpad = lambda w, shape: pad_to(w, shape).astype(jnp.bfloat16)

    # fusion weight 1: stack text-half / audio-half padded blocks along K so
    # the kernel can use either the fused K=2*H_pad dot or the split form.
    wf1_text = pad_to(p["wf1"][:hidden_dim, :], (H_pad, H_pad))
    wf1_audio = pad_to(p["wf1"][hidden_dim:, :], (H_pad, H_pad))
    wf1 = jnp.concatenate([wf1_text, wf1_audio], axis=0).astype(jnp.bfloat16)

    weights = {
        "wt1": wpad(p["wt1"], (T_pad, H_pad)),
        "wt2": wpad(p["wt2"], (H_pad, H_pad)),
        "wa1": wpad(p["wa1"], (A_pad, H_pad)),
        "wa2": wpad(p["wa2"], (H_pad, H_pad)),
        "wf1": wf1,
        "wf2": wpad(p["wf2"], (H_pad, O_pad)),
    }

    # pack the six biases into one (8, PW) f32 buffer; padded lanes stay zero
    biases = jnp.zeros((8, PW), jnp.float32)
    biases = biases.at[0, :hidden_dim].set(p["bt1"][0])
    biases = biases.at[1, :hidden_dim].set(p["bt2"][0])
    biases = biases.at[2, :hidden_dim].set(p["ba1"][0])
    biases = biases.at[3, :hidden_dim].set(p["ba2"][0])
    biases = biases.at[4, :hidden_dim].set(p["bf1"][0])
    biases = biases.at[5, :output_dim].set(p["bf2"][0])

    return weights, biases, (T_pad, A_pad, H_pad, O_pad)


# ---------------------------------------------------------------------------
# reference (mirrors the PyTorch forward, incl. explicit cat; bf16 matmul
# inputs with f32 accumulation so it matches the kernel's numerics)
# ---------------------------------------------------------------------------

def reference_forward(text_input, audio_input, p):
    def lin(x, w, b):
        return jnp.dot(x.astype(jnp.bfloat16), w.astype(jnp.bfloat16),
                       preferred_element_type=jnp.float32) + b

    relu = lambda x: jnp.maximum(x, 0.0)
    h_t = relu(lin(relu(lin(text_input, p["wt1"], p["bt1"])), p["wt2"], p["bt2"]))
    h_a = relu(lin(relu(lin(audio_input, p["wa1"], p["ba1"])), p["wa2"], p["ba2"]))
    fused = jnp.concatenate([h_t, h_a], axis=1)
    f = relu(lin(fused, p["wf1"], p["bf1"]))
    return lin(f, p["wf2"], p["bf2"])


# ---------------------------------------------------------------------------
# demo / self-check
# ---------------------------------------------------------------------------

if __name__ == "__main__":
    text_dim, audio_dim, hidden_dim, output_dim = 16, 24, 32, 8
    batch = 2

    key = jax.random.PRNGKey(0)
    k_params, k_text, k_audio = jax.random.split(key, 3)

    params = init_params(k_params, text_dim, audio_dim, hidden_dim, output_dim)
    weights, biases, dims = prepare_kernel_params(
        params, text_dim, audio_dim, hidden_dim, output_dim)

    text_input = jax.random.normal(k_text, (batch, text_dim), jnp.float32)
    audio_input = jax.random.normal(k_audio, (batch, audio_dim), jnp.float32)

    fwd = jax.jit(functools.partial(
        multimodal_mlp_forward, weights=weights, biases=biases, dims=dims))
    out_padded = jax.block_until_ready(fwd(text_input, audio_input))

    # consumer-side slice of the padded block
    out = out_padded[:batch, :output_dim]
    ref = reference_forward(text_input, audio_input, params)

    assert out.shape == (batch, output_dim)
    assert jnp.allclose(out, ref, atol=2e-3, rtol=2e-3), (out, ref)

    print("KERNEL_OK")
</pallas_src>

<mosaic_0001>
module attributes {stable_mosaic.version = 11 : i64} {
  func.func @mm_mlp_kernel(%arg0: i32, %arg1: memref<16x128xbf16, #tpu.memory_space<vmem>>, %arg2: memref<16x128xbf16, #tpu.memory_space<vmem>>, %arg3: memref<128x128xbf16, #tpu.memory_space<vmem>>, %arg4: memref<128x128xbf16, #tpu.memory_space<vmem>>, %arg5: memref<128x128xbf16, #tpu.memory_space<vmem>>, %arg6: memref<128x128xbf16, #tpu.memory_space<vmem>>, %arg7: memref<256x128xbf16, #tpu.memory_space<vmem>>, %arg8: memref<128x128xbf16, #tpu.memory_space<vmem>>, %arg9: memref<8x128xf32, #tpu.memory_space<vmem>>, %arg10: memref<16x128xf32, #tpu.memory_space<vmem>>) attributes {dimension_semantics = [#tpu.dimension_semantics<parallel>], iteration_bounds = array<i64: 1>, scalar_prefetch = 0 : i64, scratch_operands = 0 : i64, tpu.core_type = #tpu.core_type<tc>, window_params = [{transform_indices = @transform_0, window_bounds = array<i64: 16, 128>}, {transform_indices = @transform_1, window_bounds = array<i64: 16, 128>}, {pipeline_mode = #tpu.pipeline_mode<synchronous>, transform_indices = @transform_2, window_bounds = array<i64: 128, 128>}, {pipeline_mode = #tpu.pipeline_mode<synchronous>, transform_indices = @transform_3, window_bounds = array<i64: 128, 128>}, {pipeline_mode = #tpu.pipeline_mode<synchronous>, transform_indices = @transform_4, window_bounds = array<i64: 128, 128>}, {pipeline_mode = #tpu.pipeline_mode<synchronous>, transform_indices = @transform_5, window_bounds = array<i64: 128, 128>}, {pipeline_mode = #tpu.pipeline_mode<synchronous>, transform_indices = @transform_6, window_bounds = array<i64: 256, 128>}, {pipeline_mode = #tpu.pipeline_mode<synchronous>, transform_indices = @transform_7, window_bounds = array<i64: 128, 128>}, {pipeline_mode = #tpu.pipeline_mode<synchronous>, transform_indices = @transform_8, window_bounds = array<i64: 8, 128>}, {transform_indices = @transform_9, window_bounds = array<i64: 16, 128>}]} {
    %c0 = arith.constant 0 : index
    %c0_0 = arith.constant 0 : index
    %0 = vector.load %arg9[%c0, %c0_0] : memref<8x128xf32, #tpu.memory_space<vmem>>, vector<8x128xf32>
    %1 = vector.extract_strided_slice %0 {offsets = [0, 0], sizes = [1, 128], strides = [1, 1]} : vector<8x128xf32> to vector<1x128xf32>
    %2 = vector.extract_strided_slice %0 {offsets = [1, 0], sizes = [1, 128], strides = [1, 1]} : vector<8x128xf32> to vector<1x128xf32>
    %3 = vector.extract_strided_slice %0 {offsets = [2, 0], sizes = [1, 128], strides = [1, 1]} : vector<8x128xf32> to vector<1x128xf32>
    %4 = vector.extract_strided_slice %0 {offsets = [3, 0], sizes = [1, 128], strides = [1, 1]} : vector<8x128xf32> to vector<1x128xf32>
    %5 = vector.extract_strided_slice %0 {offsets = [4, 0], sizes = [1, 128], strides = [1, 1]} : vector<8x128xf32> to vector<1x128xf32>
    %6 = vector.extract_strided_slice %0 {offsets = [5, 0], sizes = [1, 128], strides = [1, 1]} : vector<8x128xf32> to vector<1x128xf32>
    %c0_1 = arith.constant 0 : index
    %c0_2 = arith.constant 0 : index
    %7 = vector.load %arg1[%c0_1, %c0_2] : memref<16x128xbf16, #tpu.memory_space<vmem>>, vector<16x128xbf16>
    %c0_3 = arith.constant 0 : index
    %c0_4 = arith.constant 0 : index
    %8 = vector.load %arg3[%c0_3, %c0_4] : memref<128x128xbf16, #tpu.memory_space<vmem>>, vector<128x128xbf16>
    %cst = arith.constant dense<0.000000e+00> : vector<16x128xf32>
    %9 = tpu.matmul %7, %8, %cst {dimension_numbers = #tpu.dot_dimension_numbers<[1], [0], [0], [1], [0, 0, 1, 1], [], []>} : vector<16x128xbf16>, vector<128x128xbf16>, vector<16x128xf32> -> vector<16x128xf32>
    %10 = vector.broadcast %1 : vector<1x128xf32> to vector<16x128xf32>
    %11 = arith.addf %9, %10 : vector<16x128xf32>
    %cst_5 = arith.constant 0.000000e+00 : f32
    %12 = vector.broadcast %cst_5 : f32 to vector<16x128xf32>
    %13 = arith.maximumf %11, %12 : vector<16x128xf32>
    %14 = arith.truncf %13 : vector<16x128xf32> to vector<16x128xbf16>
    %c0_6 = arith.constant 0 : index
    %c0_7 = arith.constant 0 : index
    %15 = vector.load %arg4[%c0_6, %c0_7] : memref<128x128xbf16, #tpu.memory_space<vmem>>, vector<128x128xbf16>
    %cst_8 = arith.constant dense<0.000000e+00> : vector<16x128xf32>
    %16 = tpu.matmul %14, %15, %cst_8 {dimension_numbers = #tpu.dot_dimension_numbers<[1], [0], [0], [1], [0, 0, 1, 1], [], []>} : vector<16x128xbf16>, vector<128x128xbf16>, vector<16x128xf32> -> vector<16x128xf32>
    %17 = vector.broadcast %2 : vector<1x128xf32> to vector<16x128xf32>
    %18 = arith.addf %16, %17 : vector<16x128xf32>
    %cst_9 = arith.constant 0.000000e+00 : f32
    %19 = vector.broadcast %cst_9 : f32 to vector<16x128xf32>
    %20 = arith.maximumf %18, %19 : vector<16x128xf32>
    %21 = arith.truncf %20 : vector<16x128xf32> to vector<16x128xbf16>
    %c0_10 = arith.constant 0 : index
    %c0_11 = arith.constant 0 : index
    %22 = vector.load %arg2[%c0_10, %c0_11] : memref<16x128xbf16, #tpu.memory_space<vmem>>, vector<16x128xbf16>
    %c0_12 = arith.constant 0 : index
    %c0_13 = arith.constant 0 : index
    %23 = vector.load %arg5[%c0_12, %c0_13] : memref<128x128xbf16, #tpu.memory_space<vmem>>, vector<128x128xbf16>
    %cst_14 = arith.constant dense<0.000000e+00> : vector<16x128xf32>
    %24 = tpu.matmul %22, %23, %cst_14 {dimension_numbers = #tpu.dot_dimension_numbers<[1], [0], [0], [1], [0, 0, 1, 1], [], []>} : vector<16x128xbf16>, vector<128x128xbf16>, vector<16x128xf32> -> vector<16x128xf32>
    %25 = vector.broadcast %3 : vector<1x128xf32> to vector<16x128xf32>
    %26 = arith.addf %24, %25 : vector<16x128xf32>
    %cst_15 = arith.constant 0.000000e+00 : f32
    %27 = vector.broadcast %cst_15 : f32 to vector<16x128xf32>
    %28 = arith.maximumf %26, %27 : vector<16x128xf32>
    %29 = arith.truncf %28 : vector<16x128xf32> to vector<16x128xbf16>
    %c0_16 = arith.constant 0 : index
    %c0_17 = arith.constant 0 : index
    %30 = vector.load %arg6[%c0_16, %c0_17] : memref<128x128xbf16, #tpu.memory_space<vmem>>, vector<128x128xbf16>
    %cst_18 = arith.constant dense<0.000000e+00> : vector<16x128xf32>
    %31 = tpu.matmul %29, %30, %cst_18 {dimension_numbers = #tpu.dot_dimension_numbers<[1], [0], [0], [1], [0, 0, 1, 1], [], []>} : vector<16x128xbf16>, vector<128x128xbf16>, vector<16x128xf32> -> vector<16x128xf32>
    %32 = vector.broadcast %4 : vector<1x128xf32> to vector<16x128xf32>
    %33 = arith.addf %31, %32 : vector<16x128xf32>
    %cst_19 = arith.constant 0.000000e+00 : f32
    %34 = vector.broadcast %cst_19 : f32 to vector<16x128xf32>
    %35 = arith.maximumf %33, %34 : vector<16x128xf32>
    %36 = arith.truncf %35 : vector<16x128xf32> to vector<16x128xbf16>
    %37 = tpu.concatenate %21, %36 in 1 : vector<16x128xbf16>, vector<16x128xbf16> -> vector<16x256xbf16>
    %c0_20 = arith.constant 0 : index
    %c0_21 = arith.constant 0 : index
    %38 = vector.load %arg7[%c0_20, %c0_21] : memref<256x128xbf16, #tpu.memory_space<vmem>>, vector<256x128xbf16>
    %cst_22 = arith.constant dense<0.000000e+00> : vector<16x128xf32>
    %39 = tpu.matmul %37, %38, %cst_22 {dimension_numbers = #tpu.dot_dimension_numbers<[1], [0], [0], [1], [0, 0, 1, 1], [], []>} : vector<16x256xbf16>, vector<256x128xbf16>, vector<16x128xf32> -> vector<16x128xf32>
    %40 = vector.broadcast %5 : vector<1x128xf32> to vector<16x128xf32>
    %41 = arith.addf %39, %40 : vector<16x128xf32>
    %cst_23 = arith.constant 0.000000e+00 : f32
    %42 = vector.broadcast %cst_23 : f32 to vector<16x128xf32>
    %43 = arith.maximumf %41, %42 : vector<16x128xf32>
    %44 = arith.truncf %43 : vector<16x128xf32> to vector<16x128xbf16>
    %c0_24 = arith.constant 0 : index
    %c0_25 = arith.constant 0 : index
    %45 = vector.load %arg8[%c0_24, %c0_25] : memref<128x128xbf16, #tpu.memory_space<vmem>>, vector<128x128xbf16>
    %cst_26 = arith.constant dense<0.000000e+00> : vector<16x128xf32>
    %46 = tpu.matmul %44, %45, %cst_26 {dimension_numbers = #tpu.dot_dimension_numbers<[1], [0], [0], [1], [0, 0, 1, 1], [], []>} : vector<16x128xbf16>, vector<128x128xbf16>, vector<16x128xf32> -> vector<16x128xf32>
    %47 = vector.broadcast %6 : vector<1x128xf32> to vector<16x128xf32>
    %48 = arith.addf %46, %47 : vector<16x128xf32>
    %c0_27 = arith.constant 0 : index
    %c0_28 = arith.constant 0 : index
    %49 = vector.load %arg10[%c0_27, %c0_28] : memref<16x128xf32, #tpu.memory_space<vmem>>, vector<16x128xf32>
    tpu.vector_store %arg10[%c0_27, %c0_28], %48 {strides = array<i32>} : memref<16x128xf32, #tpu.memory_space<vmem>>, vector<16x128xf32>,
    return
  }
  func.func @transform_0(%arg0: i32) -> (i32, i32) {
    %c0_i32 = arith.constant 0 : i32
    %c0_i32_0 = arith.constant 0 : i32
    return %arg0, %c0_i32 : i32, i32
  }
  func.func @transform_1(%arg0: i32) -> (i32, i32) {
    %c0_i32 = arith.constant 0 : i32
    %c0_i32_0 = arith.constant 0 : i32
    return %arg0, %c0_i32 : i32, i32
  }
  func.func @transform_2(%arg0: i32) -> (i32, i32) {
    %c0_i32 = arith.constant 0 : i32
    %c0_i32_0 = arith.constant 0 : i32
    %c0_i32_1 = arith.constant 0 : i32
    return %c0_i32, %c0_i32_0 : i32, i32
  }
  func.func @transform_3(%arg0: i32) -> (i32, i32) {
    %c0_i32 = arith.constant 0 : i32
    %c0_i32_0 = arith.constant 0 : i32
    %c0_i32_1 = arith.constant 0 : i32
    return %c0_i32, %c0_i32_0 : i32, i32
  }
  func.func @transform_4(%arg0: i32) -> (i32, i32) {
    %c0_i32 = arith.constant 0 : i32
    %c0_i32_0 = arith.constant 0 : i32
    %c0_i32_1 = arith.constant 0 : i32
    return %c0_i32, %c0_i32_0 : i32, i32
  }
  func.func @transform_5(%arg0: i32) -> (i32, i32) {
    %c0_i32 = arith.constant 0 : i32
    %c0_i32_0 = arith.constant 0 : i32
    %c0_i32_1 = arith.constant 0 : i32
    return %c0_i32, %c0_i32_0 : i32, i32
  }
  func.func @transform_6(%arg0: i32) -> (i32, i32) {
    %c0_i32 = arith.constant 0 : i32
    %c0_i32_0 = arith.constant 0 : i32
    %c0_i32_1 = arith.constant 0 : i32
    return %c0_i32, %c0_i32_0 : i32, i32
  }
  func.func @transform_7(%arg0: i32) -> (i32, i32) {
    %c0_i32 = arith.constant 0 : i32
    %c0_i32_0 = arith.constant 0 : i32
    %c0_i32_1 = arith.constant 0 : i32
    return %c0_i32, %c0_i32_0 : i32, i32
  }
  func.func @transform_8(%arg0: i32) -> (i32, i32) {
    %c0_i32 = arith.constant 0 : i32
    %c0_i32_0 = arith.constant 0 : i32
    %c0_i32_1 = arith.constant 0 : i32
    return %c0_i32, %c0_i32_0 : i32, i32
  }
  func.func @transform_9(%arg0: i32) -> (i32, i32) {
    %c0_i32 = arith.constant 0 : i32
    %c0_i32_0 = arith.constant 0 : i32
    return %arg0, %c0_i32 : i32, i32
  }
}

</mosaic_0001>

<bundles_post_ra>
// kernel: multimodal_mlp_forward.1
= control target key start
LH: loop header
LB: loop body
LE: loop exit
PB: predicated region body
PF: predicated region fallthrough
CT: control target
= control target key end

     0   :  { %14 = vsyncpa [#allocation3], 0  ;;  %s1570_s0 = inlined_call_operand.vmem [shape: bf16[16,128], index: 0, kind: input, shape index: {}]   ;;  %s1571_s1 = inlined_call_operand.vmem [shape: bf16[16,128], index: 1, kind: input, shape index: {}]   ;;  %s1572_s2 = inlined_call_operand.hbm [shape: bf16[128,128], index: 2, kind: input, shape index: {}]   ;;  %s1573_s3 = inlined_call_operand.hbm [shape: bf16[128,128], index: 3, kind: input, shape index: {}]   ;;  %s1574_s4 = inlined_call_operand.hbm [shape: bf16[128,128], index: 4, kind: input, shape index: {}]   ;;  %s1575_s5 = inlined_call_operand.hbm [shape: bf16[128,128], index: 5, kind: input, shape index: {}]   ;;  %s1576_s6 = inlined_call_operand.hbm [shape: bf16[256,128], index: 6, kind: input, shape index: {}]   ;;  %s1577_s7 = inlined_call_operand.vmem [shape: bf16[128,128], index: 7, kind: input, shape index: {}]   ;;  %s1578_s8 = inlined_call_operand.vmem [shape: f32[8,128], index: 8, kind: input, shape index: {}]   ;;  %s1579_s9 = inlined_call_operand.hbm [shape: f32[16,128], index: 9, kind: output, shape index: {}]  }
   0x1   :  { %15 = vsyncpa [#allocation6], 0 }
   0x2   :  { %16 = vsyncpa [#allocation9], 0 }
   0x3   :  { %17 = vsyncpa [#allocation4], 0  ;;  %s1308_s30 = smov [#allocation5]   ;;  %s1309_s11 = smov [#allocation8]  }
   0x4   :  { %s39_s10 = sshll.u32 %s1308_s30, 4  ;;  %s63_s12 = sshll.u32 %s1309_s11, 4  ;;  %s40_s10 = int_to_ptr.vmem [resolvable:$true] %s39_s10  ;;  %s1370_s12 = int_to_ptr.vmem [resolvable:$true] %s63_s12 }
   0x5   :  { %s1168_s15 = scalar_lea.hbm %s1573_s3, 1024 }
   0x6   :  { %p1169_p0 = scmp.ne.s32.totalorder %s1573_s3, %s1168_s15  ;;  %p1172_p1 = scmp.lt.u32.totalorder %s1168_s15, %s1573_s3 }
   0x8   :  { %p1174_p2 = pnand %p1172_p1, %p1169_p0 }
   0xa   :  { %1177 = shalt.err (!%p1174_p2)
}
   0xb   :  { %s1178_s20 = scalar_lea.vmem %s40_s10, 1024  ;;  %p1183_p4 = scmp.lt.s32.totalorder %s40_s10, %s40_s10 }
   0xc   :  { %p1179_p3 = scmp.ne.s32.totalorder %s40_s10, %s1178_s20  ;;  %p1184_p5 = scmp.lt.s32.totalorder %s1178_s20, %s1178_s20 }
   0xe   :  { %p1185_p6 = por %p1184_p5, %p1183_p4 }
  0x10   :  { %p1186_p7 = pnand %p1185_p6, %p1179_p3 }
  0x12   :  { %1189 = shalt.err (!%p1186_p7)
}
  0x13   :  { %s1310_s21 = smov 64   ;;  %s1311_s22 = smov 4  }
  0x14   :  { %45 = dma.hbm_to_vmem [thread:$0]  %s1573_s3, 1024, %s40_s10, [#allocation6], %s1310_s21, %s1310_s21, %s1311_s22  }
  0x15   :  { %s1190_s27 = scalar_lea.hbm %s1575_s5, 1024 }
  0x16   :  { %p1191_p8 = scmp.ne.s32.totalorder %s1575_s5, %s1190_s27  ;;  %p1194_p9 = scmp.lt.u32.totalorder %s1190_s27, %s1575_s5 }
  0x18   :  { %p1196_p10 = pnand %p1194_p9, %p1191_p8 }
  0x1a   :  { %1199 = shalt.err (!%p1196_p10)
}
  0x1b   :  { %s1200_s13 = scalar_lea.vmem %s1370_s12, 1024  ;;  %p1205_p12 = scmp.lt.s32.totalorder %s1370_s12, %s1370_s12 }
  0x1c   :  { %p1201_p11 = scmp.ne.s32.totalorder %s1370_s12, %s1200_s13  ;;  %p1206_p13 = scmp.lt.s32.totalorder %s1200_s13, %s1200_s13 }
  0x1e   :  { %p1207_p0 = por %p1206_p13, %p1205_p12 }
  0x20   :  { %p1208_p1 = pnand %p1207_p0, %p1201_p11 }
  0x22   :  { %1211 = shalt.err (!%p1208_p1)
}
  0x23   :  { %69 = dma.hbm_to_vmem [thread:$0]  %s1575_s5, 1024, %s1370_s12, [#allocation9], %s1310_s21, %s1310_s21, %s1311_s22  }
  0x24   :  { %s1312_s14 = smov [#allocation2]   ;;  %s1313_s16 = smov [#allocation7]  }
  0x25   :  { %s27_s15 = sshll.u32 %s1312_s14, 4  ;;  %s51_s17 = sshll.u32 %s1313_s16, 4  ;;  %s28_s15 = int_to_ptr.vmem [resolvable:$true] %s27_s15  ;;  %s1407_s17 = int_to_ptr.vmem [resolvable:$true] %s51_s17 }
  0x26   :  { %s1212_s20 = scalar_lea.hbm %s1572_s2, 1024 }
  0x27   :  { %p1213_p2 = scmp.ne.s32.totalorder %s1572_s2, %s1212_s20  ;;  %p1216_p3 = scmp.lt.u32.totalorder %s1212_s20, %s1572_s2 }
  0x29   :  { %p1218_p4 = pnand %p1216_p3, %p1213_p2 }
  0x2b   :  { %1221 = shalt.err (!%p1218_p4)
}
  0x2c   :  { %s1222_s5 = scalar_lea.vmem %s28_s15, 1024  ;;  %p1227_p6 = scmp.lt.s32.totalorder %s28_s15, %s28_s15 }
  0x2d   :  { %p1223_p5 = scmp.ne.s32.totalorder %s28_s15, %s1222_s5  ;;  %p1228_p7 = scmp.lt.s32.totalorder %s1222_s5, %s1222_s5 }
  0x2f   :  { %p1229_p8 = por %p1228_p7, %p1227_p6 }
  0x31   :  { %p1230_p9 = pnand %p1229_p8, %p1223_p5 }
  0x33   :  { %1233 = shalt.err (!%p1230_p9)
}
  0x34   :  { %33 = dma.hbm_to_vmem [thread:$0]  %s1572_s2, 1024, %s28_s15, [#allocation3], %s1310_s21, %s1310_s21, %s1311_s22  }
  0x35   :  { %s1234_s30 = scalar_lea.hbm %s1574_s4, 1024 }
  0x36   :  { %p1235_p10 = scmp.ne.s32.totalorder %s1574_s4, %s1234_s30  ;;  %p1238_p11 = scmp.lt.u32.totalorder %s1234_s30, %s1574_s4 }
  0x38   :  { %p1240_p12 = pnand %p1238_p11, %p1235_p10 }
  0x3a   :  { %1243 = shalt.err (!%p1240_p12)
}
  0x3b   :  { %s1244_s14 = scalar_lea.vmem %s1407_s17, 1024  ;;  %p1249_p0 = scmp.lt.s32.totalorder %s1407_s17, %s1407_s17 }
  0x3c   :  { %p1245_p13 = scmp.ne.s32.totalorder %s1407_s17, %s1244_s14  ;;  %p1250_p1 = scmp.lt.s32.totalorder %s1244_s14, %s1244_s14 }
  0x3e   :  { %p1251_p2 = por %p1250_p1, %p1249_p0 }
  0x40   :  { %p1252_p3 = pnand %p1251_p2, %p1245_p13 }
  0x42   :  { %1255 = shalt.err (!%p1252_p3)
}
  0x43   :  { %57 = dma.hbm_to_vmem [thread:$0]  %s1574_s4, 1024, %s1407_s17, [#allocation6], %s1310_s21, %s1310_s21, %s1311_s22  }
  0x44   :  { %s1314_s16 = smov [#allocation10]   ;;  %s1256_s23 = scalar_lea.hbm %s1576_s6, 2048 }
  0x45   :  { %s75_s18 = sshll.u32 %s1314_s16, 4  ;;  %p1257_p4 = scmp.ne.s32.totalorder %s1576_s6, %s1256_s23  ;;  %s76_s18 = int_to_ptr.vmem [resolvable:$true] %s75_s18 }
  0x46   :  { %p1260_p5 = scmp.lt.u32.totalorder %s1256_s23, %s1576_s6 }
  0x48   :  { %p1262_p6 = pnand %p1260_p5, %p1257_p4 }
  0x4a   :  { %1265 = shalt.err (!%p1262_p6)
}
  0x4b   :  { %s1266_s12 = scalar_lea.vmem %s76_s18, 2048  ;;  %p1271_p8 = scmp.lt.s32.totalorder %s76_s18, %s76_s18 }
  0x4c   :  { %p1267_p7 = scmp.ne.s32.totalorder %s76_s18, %s1266_s12  ;;  %p1272_p9 = scmp.lt.s32.totalorder %s1266_s12, %s1266_s12 }
  0x4e   :  { %p1273_p10 = por %p1272_p9, %p1271_p8 }
  0x50   :  { %p1274_p11 = pnand %p1273_p10, %p1267_p7 }
  0x52   :  { %1277 = shalt.err (!%p1274_p11)
}
  0x53   :  { %81 = dma.hbm_to_vmem [thread:$0]  %s1576_s6, 2048, %s76_s18, [#allocation9], %s1310_s21, %s1310_s21, %s1311_s22  }
  0x54   :  { %1300 = dma.done.wait [#allocation3], 1024  }
  0x55   :  { %1301 = vsyncadd [#allocation3], 4294966272 }
  0x56   :  { %1302 = dma.done.wait [#allocation6], 2048  }
  0x57   :  { %1303 = vsyncadd [#allocation6], 4294965248 }
  0x58   :  { %1304 = dma.done.wait [#allocation9], 3072  }
  0x59   :  { %1305 = vsyncadd [#allocation9], 4294964224  ;;  %v1315_v0 = vmov 0.0   ;;  %vm1316_vm0 = vmmov 0   ;;  %v1110_v1 = vld [vmem:[#allocation2] sm:$0xff]   ;;  %v1111_v2 = vld [vmem:[#allocation2 + $0x8] sm:$0xff]   ;;  %v121_v27 = vlaneseq }
  0x5a   :  { %998 = vmatprep.subr.bf16.mxu0 %v1315_v0  ;;  %1014 = vmatprep.mubr.msk.bf16.mxu0 %vm1316_vm0, %v1315_v0  ;;  %v1112_v3 = vld [vmem:[#allocation2 + $0x10] sm:$0xff]   ;;  %v1113_v4 = vld [vmem:[#allocation2 + $0x18] sm:$0xff]   ;;  %v1114_v5 = vld [vmem:[#allocation2 + $0x20] sm:$0xff]  }
  0x5b   :  { %1018 = vmatprep.subr.bf16.mxu1 %v1315_v0  ;;  %1034 = vmatprep.mubr.msk.bf16.mxu1 %vm1316_vm0, %v1315_v0  ;;  %v1115_v6 = vld [vmem:[#allocation2 + $0x28] sm:$0xff]   ;;  %v1128_v7 = vld [vmem:[#allocation5] sm:$0xff]   ;;  %v1116_v9 = vld [vmem:[#allocation2 + $0x30] sm:$0xff]   ;;  %v1496_v28 = vshrl.u32 %v121_v27, 7 }
  0x5c   :  { %999 = vmatpush3.bf16.msra.mxu0 %v1110_v1  ;;  %1019 = vmatpush3.bf16.msra.mxu1 %v1128_v7  ;;  %v1129_v8 = vld [vmem:[#allocation5 + $0x8] sm:$0xff]   ;;  %v1117_v10 = vld [vmem:[#allocation2 + $0x38] sm:$0xff]   ;;  %v1130_v11 = vld [vmem:[#allocation5 + $0x10] sm:$0xff]  }
  0x5d   :  { %1000 = vmatprep.subr.bf16.mxu0 %v1315_v0  ;;  %1020 = vmatprep.subr.bf16.mxu1 %v1315_v0  ;;  %v1131_v12 = vld [vmem:[#allocation5 + $0x18] sm:$0xff]   ;;  %v1118_v13 = vld [vmem:[%s1570_s0] sm:$0xff]   ;;  %v1120_v16 = vld [vmem:[#allocation7 + $0x8] sm:$0xff]   ;;  %v123_v29 = vsub.s32 0, %v1496_v28  ;;  %v355_v46 = vsub.s32 2, %v1496_v28 }
  0x5e   :  { %v1119_v14 = vld [vmem:[#allocation7] sm:$0xff]   ;;  %v1133_v17 = vld [vmem:[#allocation5 + $0x28] sm:$0xff]   ;;  %v1121_v18 = vld [vmem:[#allocation7 + $0x10] sm:$0xff]  }
  0x5f   :  { %v1132_v15 = vld [vmem:[#allocation5 + $0x20] sm:$0xff]   ;;  %v1122_v19 = vld [vmem:[#allocation7 + $0x18] sm:$0xff]   ;;  %v1124_v21 = vld [vmem:[#allocation7 + $0x28] sm:$0xff]  }
  0x60   :  { %1001 = vmatpush3.bf16.msra.mxu0 %v1111_v2  ;;  %1021 = vmatpush3.bf16.msra.mxu1 %v1129_v8  ;;  %v1123_v20 = vld [vmem:[#allocation7 + $0x20] sm:$0xff]   ;;  %v1125_v22 = vld [vmem:[#allocation7 + $0x30] sm:$0xff]   ;;  %v1126_v23 = vld [vmem:[#allocation7 + $0x38] sm:$0xff]  }
  0x61   :  { %1002 = vmatprep.subr.bf16.mxu0 %v1315_v0  ;;  %1022 = vmatprep.subr.bf16.mxu1 %v1315_v0  ;;  %v1127_v24 = vld [vmem:[%s1571_s1] sm:$0xff]   ;;  %v1134_v25 = vld [vmem:[#allocation5 + $0x30] sm:$0xff]   ;;  %v1135_v26 = vld [vmem:[#allocation5 + $0x38] sm:$0xff]  }
  0x62   :  { %v1502_v30 = vld [vmem:[%s1578_s8] sm:$0xff]  ;;  %v1137_v42 = vld [vmem:[#allocation8 + $0x8] sm:$0xff]   ;;  %v1138_v43 = vld [vmem:[#allocation8 + $0x10] sm:$0xff]  }
  0x63   :  { %v124_v31 = vrot.slane %v1502_v30, %v123_v29  ;;  %v1136_v40 = vld [vmem:[#allocation8] sm:$0xff]   ;;  %v1139_v44 = vld [vmem:[#allocation8 + $0x18] sm:$0xff]   ;;  %v1141_v47 = vld [vmem:[#allocation8 + $0x28] sm:$0xff]   ;;  %v356_v48 = vrot.slane %v1502_v30, %v355_v46 }
  0x64   :  { %1003 = vmatpush3.bf16.msra.mxu0 %v1112_v3  ;;  %1023 = vmatpush3.bf16.msra.mxu1 %v1130_v11  ;;  %v1140_v45 = vld [vmem:[#allocation8 + $0x20] sm:$0xff]   ;;  %v1142_v49 = vld [vmem:[#allocation8 + $0x30] sm:$0xff]   ;;  %v1143_v54 = vld [vmem:[#allocation8 + $0x38] sm:$0xff]  }
  0x65   :  { %1004 = vmatprep.subr.bf16.mxu0 %v1315_v0  ;;  %1024 = vmatprep.subr.bf16.mxu1 %v1315_v0  ;;  %v1144_v60 = vld [vmem:[#allocation10 + $0x40] sm:$0xff]   ;;  %v1146_v62 = vld [vmem:[#allocation10 + $0x48] sm:$0xff]   ;;  %v1148_v1 = vld [vmem:[#allocation10 + $0x50] sm:$0xff]  }
  0x66   :  { %v1145_v61 = vld [vmem:[#allocation10] sm:$0xff]   ;;  %v1147_v63 = vld [vmem:[#allocation10 + $0x8] sm:$0xff]   ;;  %v1149_v2 = vld [vmem:[#allocation10 + $0x10] sm:$0xff]  }
  0x67   :  { %v1150_v3 = vld [vmem:[#allocation10 + $0x58] sm:$0xff]   ;;  %v1154_v7 = vld [vmem:[#allocation10 + $0x68] sm:$0xff]  }
  0x68   :  { %1005 = vmatpush3.bf16.msra.mxu0 %v1113_v4  ;;  %1025 = vmatpush3.bf16.msra.mxu1 %v1131_v12  ;;  %v1151_v4 = vld [vmem:[#allocation10 + $0x18] sm:$0xff]   ;;  %v1155_v8 = vld [vmem:[#allocation10 + $0x28] sm:$0xff]  }
  0x69   :  { %1006 = vmatprep.subr.bf16.mxu0 %v1315_v0  ;;  %1026 = vmatprep.subr.bf16.mxu1 %v1315_v0  ;;  %v1158_v11 = vld [vmem:[#allocation10 + $0x78] sm:$0xff]  }
  0x6a   :  { %v1159_v12 = vld [vmem:[#allocation10 + $0x38] sm:$0xff]  }
  0x6c   :  { %1007 = vmatpush3.bf16.msra.mxu0 %v1114_v5  ;;  %1027 = vmatpush3.bf16.msra.mxu1 %v1132_v15  ;;  %v1152_v5 = vld [vmem:[#allocation10 + $0x60] sm:$0xff]   ;;  %v1162_v15 = vld [vmem:[%s1577_s7 + $0x10] sm:$0xff]  }
  0x6d   :  { %1008 = vmatprep.subr.bf16.mxu0 %v1315_v0  ;;  %1028 = vmatprep.subr.bf16.mxu1 %v1315_v0 }
  0x70   :  { %1009 = vmatpush3.bf16.msra.mxu0 %v1115_v6  ;;  %1029 = vmatpush3.bf16.msra.mxu1 %v1133_v17  ;;  %v1153_v6 = vld [vmem:[#allocation10 + $0x20] sm:$0xff]  }
  0x71   :  { %1010 = vmatprep.subr.bf16.mxu0 %v1315_v0  ;;  %1030 = vmatprep.subr.bf16.mxu1 %v1315_v0  ;;  %v1164_v17 = vld [vmem:[%s1577_s7 + $0x20] sm:$0xff]  }
  0x74   :  { %1011 = vmatpush3.bf16.msra.mxu0 %v1116_v9  ;;  %1031 = vmatpush3.bf16.msra.mxu1 %v1134_v25  ;;  %v1156_v9 = vld [vmem:[#allocation10 + $0x70] sm:$0xff]  }
  0x75   :  { %1012 = vmatprep.subr.bf16.mxu0 %v1315_v0  ;;  %1032 = vmatprep.subr.bf16.mxu1 %v1315_v0 }
  0x78   :  { %1013 = vmatpush3.bf16.msra.mxu0 %v1117_v10  ;;  %1033 = vmatpush3.bf16.msra.mxu1 %v1135_v26  ;;  %v1157_v10 = vld [vmem:[#allocation10 + $0x30] sm:$0xff]  }
  0x79   :  { %1038 = vmatprep.subr.bf16.mxu0 %v1315_v0  ;;  %1058 = vmatprep.subr.bf16.mxu1 %v1315_v0 }
  0x7b   :  { %1015 = vmatmul.mubr.bf16.vlgmr.msra.gmra.mrb[0].mxu0 %v1118_v13  ;;  %v1160_v13 = vld [vmem:[%s1577_s7] sm:$0xff]  }
  0x7c   :  { %1039 = vmatpush3.bf16.msra.mxu0 %v1119_v14  ;;  %1054 = vmatprep.mubr.msk.bf16.mxu0 %vm1316_vm0, %v1315_v0  ;;  %v1161_v14 = vld [vmem:[%s1577_s7 + $0x8] sm:$0xff]  }
  0x7d   :  { %1040 = vmatprep.subr.bf16.mxu0 %v1315_v0 }
  0x80   :  { %1041 = vmatpush3.bf16.msra.mxu0 %v1120_v16  ;;  %v1163_v16 = vld [vmem:[%s1577_s7 + $0x18] sm:$0xff]  }
  0x81   :  { %1042 = vmatprep.subr.bf16.mxu0 %v1315_v0 }
  0x84   :  { %1043 = vmatpush3.bf16.msra.mxu0 %v1121_v18  ;;  %v241_v18 = vsub.s32 1, %v1496_v28 }
  0x85   :  { %1044 = vmatprep.subr.bf16.mxu0 %v1315_v0 }
  0x88   :  { %1045 = vmatpush3.bf16.msra.mxu0 %v1122_v19  ;;  %v242_v19 = vrot.slane %v1502_v30, %v241_v18 }
  0x89   :  { %1046 = vmatprep.subr.bf16.mxu0 %v1315_v0 }
  0x8c   :  { %1047 = vmatpush3.bf16.msra.mxu0 %v1123_v20 }
  0x8d   :  { %1048 = vmatprep.subr.bf16.mxu0 %v1315_v0 }
  0x90   :  { %1049 = vmatpush3.bf16.msra.mxu0 %v1124_v21 }
  0x91   :  { %1050 = vmatprep.subr.bf16.mxu0 %v1315_v0 }
  0x94   :  { %1051 = vmatpush3.bf16.msra.mxu0 %v1125_v22 }
  0x95   :  { %1052 = vmatprep.subr.bf16.mxu0 %v1315_v0 }
  0x98   :  { %1053 = vmatpush3.bf16.msra.mxu0 %v1126_v23 }
  0x99   :  { %967 = vmatprep.subr.bf16.mxu0 %v1144_v60 }
  0x9b   :  { %1055 = vmatmul.mubr.bf16.vlgmr.msra.gmra.mrb[4].mxu0 %v1127_v24 }
  0x9c   :  { %968 = vmatpush3.bf16.msra.mxu0 %v1145_v61 }
  0x9d   :  { %969 = vmatprep.subr.bf16.mxu0 %v1146_v62 }
  0xa0   :  { %970 = vmatpush3.bf16.msra.mxu0 %v1147_v63 }
  0xa1   :  { %971 = vmatprep.subr.bf16.mxu0 %v1148_v1 }
  0xa4   :  { %972 = vmatpush3.bf16.msra.mxu0 %v1149_v2 }
  0xa5   :  { %973 = vmatprep.subr.bf16.mxu0 %v1150_v3 }
  0xa8   :  { %974 = vmatpush3.bf16.msra.mxu0 %v1151_v4 }
  0xa9   :  { %975 = vmatprep.subr.bf16.mxu0 %v1152_v5 }
  0xac   :  { %976 = vmatpush3.bf16.msra.mxu0 %v1153_v6 }
  0xad   :  { %977 = vmatprep.subr.bf16.mxu0 %v1154_v7 }
  0xb0   :  { %978 = vmatpush3.bf16.msra.mxu0 %v1155_v8 }
  0xb1   :  { %979 = vmatprep.subr.bf16.mxu0 %v1156_v9 }
  0xb4   :  { %980 = vmatpush3.bf16.msra.mxu0 %v1157_v10 }
  0xb5   :  { %981 = vmatprep.subr.bf16.mxu0 %v1158_v11 }
  0xb8   :  { %982 = vmatpush3.bf16.msra.mxu0 %v1159_v12 }
 0x14e   :  { %v213_v32 = vpop.f32.mrb[0].mxu0 }
 0x14f   :  { %v214_v33 = vadd.f32 %v213_v32, %v124_v31  ;;  %v1016_v34 = vpop.f32.mrb[1].mxu0 }
 0x150   :  { %v216_v35 = vpop.f32.mrb[2].mxu0 }
 0x151   :  { %v220_v36 = vmax.f32 %v214_v33, 0.0  ;;  %v217_v37 = vadd.f32 %v216_v35, %v124_v31  ;;  %v1017_v38 = vpop.f32.mrb[3].mxu0  ;;  %v473_v31 = vsub.s32 3, %v1496_v28 }
 0x153   :  { %v221_v39 = vmax.f32 %v217_v37, 0.0  ;;  %v474_v32 = vrot.slane %v1502_v30, %v473_v31 }
 0x155   :  { %v222_v41 = vpack.c.bf16 %v221_v39, %v220_v36 }
 0x157   :  { %1035 = vmatmul.mubr.bf16.vlgmr.msra.gmra.mrb[0].mxu1 %v222_v41 }
 0x158   :  { %1059 = vmatpush3.bf16.msra.mxu1 %v1136_v40  ;;  %1074 = vmatprep.mubr.msk.bf16.mxu1 %vm1316_vm0, %v1315_v0 }
 0x159   :  { %1060 = vmatprep.subr.bf16.mxu1 %v1315_v0 }
 0x15c   :  { %1061 = vmatpush3.bf16.msra.mxu1 %v1137_v42  ;;  %v1165_v42 = vld [vmem:[%s1577_s7 + $0x28] sm:$0xff]  }
 0x15d   :  { %1062 = vmatprep.subr.bf16.mxu1 %v1315_v0 }
 0x160   :  { %1063 = vmatpush3.bf16.msra.mxu1 %v1138_v43  ;;  %v1166_v43 = vld [vmem:[%s1577_s7 + $0x30] sm:$0xff]  }
 0x161   :  { %1064 = vmatprep.subr.bf16.mxu1 %v1315_v0 }
 0x164   :  { %1065 = vmatpush3.bf16.msra.mxu1 %v1139_v44  ;;  %v1167_v44 = vld [vmem:[%s1577_s7 + $0x38] sm:$0xff]   ;;  %s1317_s7 = smov [#allocation11]  }
 0x165   :  { %1066 = vmatprep.subr.bf16.mxu1 %v1315_v0  ;;  %s859_s24 = sshll.u32 %s1317_s7, 4  ;;  %s860_s24 = int_to_ptr.vmem [resolvable:$true] %s859_s24 }
 0x166   :  { %s1278_s25 = scalar_lea.vmem %s860_s24, 256  ;;  %p1283_p13 = scmp.lt.s32.totalorder %s860_s24, %s860_s24 }
 0x167   :  { %p1279_p12 = scmp.ne.s32.totalorder %s860_s24, %s1278_s25  ;;  %p1284_p0 = scmp.lt.s32.totalorder %s1278_s25, %s1278_s25 }
 0x168   :  { %1067 = vmatpush3.bf16.msra.mxu1 %v1140_v45  ;;  %v601_v45 = vsub.s32 4, %v1496_v28 }
 0x169   :  { %1068 = vmatprep.subr.bf16.mxu1 %v1315_v0  ;;  %p1285_p1 = por %p1284_p0, %p1283_p13 }
 0x16b   :  { %p1286_p2 = pnand %p1285_p1, %p1279_p12 }
 0x16c   :  { %1069 = vmatpush3.bf16.msra.mxu1 %v1141_v47  ;;  %v602_v47 = vrot.slane %v1502_v30, %v601_v45 }
 0x16d   :  { %1070 = vmatprep.subr.bf16.mxu1 %v1315_v0 }
 0x16e   :  { %v445_v50 = vpop.f32.mrb[4].mxu0 }
 0x16f   :  { %v446_v51 = vadd.f32 %v445_v50, %v356_v48  ;;  %v1056_v52 = vpop.f32.mrb[5].mxu0 }
 0x170   :  { %v448_v53 = vpop.f32.mrb[6].mxu0  ;;  %1071 = vmatpush3.bf16.msra.mxu1 %v1142_v49 }
 0x171   :  { %v449_v55 = vadd.f32 %v448_v53, %v356_v48  ;;  %v1057_v56 = vpop.f32.mrb[7].mxu0  ;;  %1072 = vmatprep.subr.bf16.mxu1 %v1315_v0  ;;  %v452_v57 = vmax.f32 %v446_v51, 0.0 }
 0x173   :  { %v453_v58 = vmax.f32 %v449_v55, 0.0 }
 0x174   :  { %1073 = vmatpush3.bf16.msra.mxu1 %v1143_v54 }
 0x175   :  { %v454_v59 = vpack.c.bf16 %v453_v58, %v452_v57  ;;  %1078 = vmatprep.subr.bf16.mxu1 %v1315_v0  ;;  %v761_v57 = vsub.s32 5, %v1496_v28 }
 0x177   :  { %1075 = vmatmul.mubr.bf16.vlgmr.msra.gmra.mrb[4].mxu1 %v454_v59  ;;  %v762_v58 = vrot.slane %v1502_v30, %v761_v57 }
 0x178   :  { %1094 = vmatprep.mubr.msk.bf16.mxu1 %vm1316_vm0, %v1315_v0  ;;  %1079 = vmatpush3.bf16.msra.mxu1 %v1160_v13 }
 0x179   :  { %1080 = vmatprep.subr.bf16.mxu1 %v1315_v0 }
 0x17c   :  { %1081 = vmatpush3.bf16.msra.mxu1 %v1161_v14 }
 0x17d   :  { %1082 = vmatprep.subr.bf16.mxu1 %v1315_v0 }
 0x180   :  { %1083 = vmatpush3.bf16.msra.mxu1 %v1162_v15 }
 0x181   :  { %1084 = vmatprep.subr.bf16.mxu1 %v1315_v0 }
 0x184   :  { %1085 = vmatpush3.bf16.msra.mxu1 %v1163_v16 }
 0x185   :  { %1086 = vmatprep.subr.bf16.mxu1 %v1315_v0 }
 0x188   :  { %1087 = vmatpush3.bf16.msra.mxu1 %v1164_v17 }
 0x189   :  { %1088 = vmatprep.subr.bf16.mxu1 %v1315_v0 }
 0x18c   :  { %1089 = vmatpush3.bf16.msra.mxu1 %v1165_v42 }
 0x18d   :  { %1090 = vmatprep.subr.bf16.mxu1 %v1315_v0 }
 0x190   :  { %1091 = vmatpush3.bf16.msra.mxu1 %v1166_v43 }
 0x191   :  { %1092 = vmatprep.subr.bf16.mxu1 %v1315_v0 }
 0x194   :  { %1093 = vmatpush3.bf16.msra.mxu1 %v1167_v44 }
 0x22a   :  { %v325_v20 = vpop.f32.mrb[0].mxu1 }
 0x22b   :  { %v326_v21 = vadd.f32 %v325_v20, %v242_v19  ;;  %v1036_v22 = vpop.f32.mrb[1].mxu1 }
 0x22c   :  { %v328_v23 = vpop.f32.mrb[2].mxu1 }
 0x22d   :  { %v329_v24 = vadd.f32 %v328_v23, %v242_v19  ;;  %v1037_v25 = vpop.f32.mrb[3].mxu1  ;;  %v332_v26 = vmax.f32 %v326_v21, 0.0 }
 0x22f   :  { %v333_v27 = vmax.f32 %v329_v24, 0.0 }
 0x231   :  { %v334_v29 = vpack.c.bf16 %v333_v27, %v332_v26 }
 0x24a   :  { %v557_v33 = vpop.f32.mrb[4].mxu1 }
 0x24b   :  { %v558_v34 = vadd.f32 %v557_v33, %v474_v32  ;;  %v1076_v35 = vpop.f32.mrb[5].mxu1 }
 0x24c   :  { %v560_v36 = vpop.f32.mrb[6].mxu1 }
 0x24d   :  { %v561_v37 = vadd.f32 %v560_v36, %v474_v32  ;;  %v1077_v38 = vpop.f32.mrb[7].mxu1  ;;  %v564_v39 = vmax.f32 %v558_v34, 0.0 }
 0x24f   :  { %v565_v40 = vmax.f32 %v561_v37, 0.0 }
 0x251   :  { %v566_v41 = vpack.c.bf16 %v565_v40, %v564_v39 }
 0x253   :  { %731 = vmatprep.mubr.bf16.mxu0 %v566_v41 }
 0x254   :  { %732 = vmatmul.mubr.bf16.vlgmr.msra.gmra.mrb[8].mxu0 %v334_v29 }
 0x327   :  { %v983_v46 = vpop.f32.mrb[8].mxu0 }
 0x328   :  { %v984_v48 = vpop.f32.mrb[9].mxu0 }
 0x329   :  { %v985_v49 = vadd.f32 %v984_v48, %v983_v46  ;;  %v986_v50 = vpop.f32.mrb[10].mxu0 }
 0x32a   :  { %v987_v51 = vpop.f32.mrb[11].mxu0 }
 0x32b   :  { %v734_v52 = vadd.f32 %v985_v49, %v602_v47  ;;  %v988_v53 = vadd.f32 %v987_v51, %v986_v50 }
 0x32d   :  { %v737_v54 = vadd.f32 %v988_v53, %v602_v47  ;;  %v740_v55 = vmax.f32 %v734_v52, 0.0 }
 0x32f   :  { %v741_v56 = vmax.f32 %v737_v54, 0.0 }
 0x331   :  { %v742_v0 = vpack.c.bf16 %v741_v56, %v740_v55 }
 0x333   :  { %1095 = vmatmul.mubr.bf16.vlgmr.msra.gmra.mrb[8].mxu1 %v742_v0 }
 0x406   :  { %v845_v59 = vpop.f32.mrb[8].mxu1 }
 0x407   :  { %v846_v60 = vadd.f32 %v845_v59, %v762_v58  ;;  %v1096_v61 = vpop.f32.mrb[9].mxu1 }
 0x408   :  { %v848_v62 = vpop.f32.mrb[10].mxu1 }
 0x409   :  { %852 = vst [vmem:[#allocation11] sm:$0xff] %v846_v60  ;;  %v849_v63 = vadd.f32 %v848_v62, %v762_v58  ;;  %v1097_v1 = vpop.f32.mrb[11].mxu1 }
 0x40b   :  { %853 = vst [vmem:[#allocation11 + $0x8] sm:$0xff] %v849_v63 }
 0x40c   :  { %1289 = shalt.err (!%p1286_p2)
}
 0x40d   :  { %s1290_s12 = scalar_lea.hbm %s1579_s9, 256 }
 0x40e   :  { %p1291_p3 = scmp.ne.s32.totalorder %s1579_s9, %s1290_s12  ;;  %p1294_p4 = scmp.lt.u32.totalorder %s1290_s12, %s1579_s9 }
 0x410   :  { %p1296_p5 = pnand %p1294_p4, %p1291_p3 }
 0x412   :  { %1299 = shalt.err (!%p1296_p5)
}
 0x413   :  { %s1318_s0 = smov 128   ;;  %s1319_s22 = smov 8  }
 0x414   :  { %865 = dma.vmem_to_hbm [thread:$0]  %s860_s24, 256, %s1579_s9, [#allocation4], %s1318_s0, %s1318_s0, %s1319_s22  }
 0x415   :  { %1306 = dma.done.wait [#allocation4], 256  }
 0x416   :  { %1307 = vsyncadd [#allocation4], 4294967040 }
 0x417   :  { %869 = vsyncpa [#allocation3], 1 }
 0x418   :  { %870 = vsyncpa [#allocation6], 1 }
 0x419   :  { %871 = vsyncpa [#allocation9], 1 }
 0x41a   :  { %872 = vsyncpa [#allocation4], 1 }

</bundles_post_ra>
